<compile_context>
chip_gen: v7x
topology: tpu7x:2x2x1
jax: 0.10.0
libtpu: 0.0.40
codegen_flags: <defaults>
</compile_context>

<pallas_src>
import jax
import jax.numpy as jnp
from jax.experimental import pallas as pl
from jax.experimental.pallas import tpu as pltpu


_NEG_FILL = -1e9  # padded vocab columns -> effectively zero softmax weight


def _round_up(x, m):
    return ((x + m - 1) // m) * m


def _vmem_budget():
    """(working-set budget, scoped vmem limit) in bytes, per TPU generation."""
    try:
        cap = int(pltpu.get_tpu_info().vmem_capacity_bytes)
    except Exception:  # conservative fallback (v7x-sized)
        cap = 64 << 20
    budget = int(cap * 0.70)
    limit = int(cap * 0.85)
    return budget, limit


def _plan_dims(d_model, vocab):
    """Lane-dense padding of d_model/vocab and K tile size."""
    d_pad = _round_up(d_model, 128)
    vocab_pad = _round_up(vocab, 128)
    if d_pad <= 2048:
        tile_k = d_pad
    else:
        tile_k = 128
        for cand in (2048, 1024, 512, 256):
            if d_pad % cand == 0:
                tile_k = cand
                break
    return d_pad, vocab_pad, tile_k


def _pick_tile_v(vocab_pad, desired):
    """Largest multiple of 128 <= desired that divides vocab_pad."""
    desired = max(128, min(int(desired), vocab_pad))
    best = 128
    t = 128
    while t <= desired:
        if vocab_pad % t == 0:
            best = t
        t += 128
    return best


def _pick_tile_rows(rows, max_rows, *, prefer=512):
    """MXU-friendly row-tile size within the VMEM-derived max."""
    rows8 = _round_up(max(rows, 1), 8)
    tr = min(prefer, int(max_rows), rows8)
    # Keep >= 2 row tiles when there is enough work (v7x megacore: 2 TCs
    # shard the "parallel" rows axis; a single tile would idle one core).
    if rows >= 256:
        tr = min(tr, max(128, _round_up((rows + 1) // 2, 128)))
    if tr >= 256:
        tr = (tr // 256) * 256
    elif tr >= 128:
        tr = 128
    else:
        tr = max(8, (tr // 8) * 8)
    return tr


def _pad_weights(weight, bias, d_pad, vocab_pad, compute_dtype=None):
    """Transpose + pad parameters once (hoisted out of the per-call path)."""
    vocab, d_model = weight.shape
    wt = weight.T  # (d_model, vocab)
    if compute_dtype is not None:
        wt = wt.astype(compute_dtype)
    if d_pad != d_model or vocab_pad != vocab:
        wt = jnp.pad(wt, ((0, d_pad - d_model), (0, vocab_pad - vocab)))
    b2 = bias.reshape(1, vocab).astype(jnp.float32)
    if vocab_pad != vocab:
        b2 = jnp.pad(b2, ((0, 0), (0, vocab_pad - vocab)),
                     constant_values=_NEG_FILL)
    return wt, b2


# ---------------------------------------------------------------------------
# Kernels
# ---------------------------------------------------------------------------
def _fused_kernel_k1(x_ref, wt_ref, b_ref, o_ref):
    """Single-K-step fused matmul + log_softmax (no accumulator scratch)."""
    logits = jnp.dot(x_ref[...], wt_ref[...],
                     preferred_element_type=jnp.float32)
    logits = logits + b_ref[...]
    m = jnp.max(logits, axis=-1, keepdims=True)
    shifted = logits - m
    lse = jnp.log(jnp.sum(jnp.exp(shifted), axis=-1, keepdims=True))
    o_ref[...] = (shifted - lse).astype(o_ref.dtype)


def _fused_kernel_acc(x_ref, wt_ref, b_ref, o_ref, acc_ref):
    """Multi-K-step fused matmul + log_softmax with f32 VMEM accumulator."""
    k = pl.program_id(1)

    @pl.when(k == 0)
    def _init():
        acc_ref[...] = jnp.zeros_like(acc_ref)

    acc_ref[...] += jnp.dot(x_ref[...], wt_ref[...],
                            preferred_element_type=jnp.float32)

    @pl.when(k == pl.num_programs(1) - 1)
    def _finalize():
        logits = acc_ref[...] + b_ref[...]
        m = jnp.max(logits, axis=-1, keepdims=True)
        shifted = logits - m
        lse = jnp.log(jnp.sum(jnp.exp(shifted), axis=-1, keepdims=True))
        o_ref[...] = (shifted - lse).astype(o_ref.dtype)


def _logits_lse_kernel(x_ref, wt_ref, b_ref, logit_ref, lse_ref,
                       acc_ref, m_sc, l_sc):
    """Vocab-tiled pass 1: write raw logits + online log-sum-exp per row."""
    j = pl.program_id(1)   # vocab tile
    k = pl.program_id(2)   # d_model tile
    last_j = pl.num_programs(1) - 1
    last_k = pl.num_programs(2) - 1

    @pl.when((j == 0) & (k == 0))
    def _init_stats():
        m_sc[...] = jnp.full_like(m_sc, -jnp.inf)
        l_sc[...] = jnp.zeros_like(l_sc)

    @pl.when(k == 0)
    def _init_acc():
        acc_ref[...] = jnp.zeros_like(acc_ref)

    acc_ref[...] += jnp.dot(x_ref[...], wt_ref[...],
                            preferred_element_type=jnp.float32)

    @pl.when(k == last_k)
    def _finish_block():
        logits = acc_ref[...] + b_ref[...]
        logit_ref[...] = logits
        m_new = jnp.maximum(m_sc[...], jnp.max(logits, axis=-1, keepdims=True))
        l_sc[...] = (l_sc[...] * jnp.exp(m_sc[...] - m_new)
                     + jnp.sum(jnp.exp(logits - m_new), axis=-1, keepdims=True))
        m_sc[...] = m_new

    @pl.when((j == last_j) & (k == last_k))
    def _write_lse():
        lse_ref[...] = m_sc[...] + jnp.log(l_sc[...])


def _normalize_kernel(logit_ref, lse_ref, o_ref):
    """Vocab-tiled pass 2: out = logits - lse."""
    o_ref[...] = (logit_ref[...] - lse_ref[...]).astype(o_ref.dtype)


# ---------------------------------------------------------------------------
# Wrappers
# ---------------------------------------------------------------------------
def _generator_apply(x, wt_pad, b_pad, vocab, *, tile_k, out_dtype=None,
                     compute_dtype=None, force_vocab_tiling=False,
                     tile_v=None):
    orig_shape = x.shape
    d_model = orig_shape[-1]
    d_pad, vocab_pad = wt_pad.shape
    if out_dtype is None:
        out_dtype = x.dtype

    rows = 1
    for d in orig_shape[:-1]:
        rows *= int(d)

    x2 = x.reshape(rows, d_model)
    if compute_dtype is not None:
        x2 = x2.astype(compute_dtype)

    x_bytes = jnp.dtype(x2.dtype).itemsize
    w_bytes = jnp.dtype(wt_pad.dtype).itemsize
    o_bytes = jnp.dtype(out_dtype).itemsize

    budget, vmem_limit = _vmem_budget()
    k_steps = d_pad // tile_k

    # ---------------- fast path: whole padded vocab in one block ------------
    fixed = 2 * tile_k * vocab_pad * w_bytes + 2 * vocab_pad * 4
    per_row = 2 * tile_k * x_bytes + 2 * vocab_pad * o_bytes
    if k_steps > 1:
        per_row += vocab_pad * 4  # f32 accumulator scratch
    max_rows_fast = (budget - fixed) // per_row if budget > fixed else 0

    use_fast = (not force_vocab_tiling) and (
        max_rows_fast >= min(128, _round_up(rows, 8)))

    if use_fast:
        tile_rows = _pick_tile_rows(rows, max_rows_fast)
        rows_pad = _round_up(rows, tile_rows)
        if rows_pad != rows or d_pad != d_model:
            x2 = jnp.pad(x2, ((0, rows_pad - rows), (0, d_pad - d_model)))

        if k_steps == 1:
            out = pl.pallas_call(
                _fused_kernel_k1,
                out_shape=jax.ShapeDtypeStruct((rows_pad, vocab_pad), out_dtype),
                grid_spec=pltpu.PrefetchScalarGridSpec(
                    num_scalar_prefetch=0,
                    grid=(rows_pad // tile_rows,),
                    in_specs=[
                        pl.BlockSpec((tile_rows, tile_k), lambda i: (i, 0)),
                        pl.BlockSpec((tile_k, vocab_pad), lambda i: (0, 0)),
                        pl.BlockSpec((1, vocab_pad), lambda i: (0, 0)),
                    ],
                    out_specs=pl.BlockSpec((tile_rows, vocab_pad),
                                           lambda i: (i, 0)),
                ),
                compiler_params=pltpu.CompilerParams(
                    dimension_semantics=("parallel",),
                    vmem_limit_bytes=vmem_limit,
                ),
            )(x2, wt_pad, b_pad)
        else:
            out = pl.pallas_call(
                _fused_kernel_acc,
                out_shape=jax.ShapeDtypeStruct((rows_pad, vocab_pad), out_dtype),
                grid_spec=pltpu.PrefetchScalarGridSpec(
                    num_scalar_prefetch=0,
                    grid=(rows_pad // tile_rows, k_steps),
                    in_specs=[
                        pl.BlockSpec((tile_rows, tile_k), lambda i, k: (i, k)),
                        pl.BlockSpec((tile_k, vocab_pad), lambda i, k: (k, 0)),
                        pl.BlockSpec((1, vocab_pad), lambda i, k: (0, 0)),
                    ],
                    out_specs=pl.BlockSpec((tile_rows, vocab_pad),
                                           lambda i, k: (i, 0)),
                    scratch_shapes=[
                        pltpu.VMEM((tile_rows, vocab_pad), jnp.float32)],
                ),
                compiler_params=pltpu.CompilerParams(
                    dimension_semantics=("parallel", "arbitrary"),
                    vmem_limit_bytes=vmem_limit,
                ),
            )(x2, wt_pad, b_pad)

        out = out[:rows, :vocab]
        return out.reshape(*orig_shape[:-1], vocab)

    # ---------------- vocab-tiled path (online log-sum-exp) -----------------
    tv = _pick_tile_v(vocab_pad, tile_v if tile_v is not None else 1024)
    fixed_t = 2 * tile_k * tv * w_bytes + 2 * tv * 4
    per_row_t = (2 * tile_k * x_bytes   # x block (double-buffered)
                 + 2 * tv * 4           # f32 logits output block
                 + tv * 4               # acc scratch
                 + 32)                  # m/l scratch + lse output
    max_rows_t = (budget - fixed_t) // per_row_t if budget > fixed_t else 0
    if max_rows_t < 8:
        raise ValueError(
            "Generator Pallas kernel: VMEM budget too small even for the "
            "vocab-tiled path; reduce tile_v or d_model tile.")
    tile_rows = _pick_tile_rows(rows, max_rows_t)
    rows_pad = _round_up(rows, tile_rows)
    if rows_pad != rows or d_pad != d_model:
        x2 = jnp.pad(x2, ((0, rows_pad - rows), (0, d_pad - d_model)))

    logits, lse = pl.pallas_call(
        _logits_lse_kernel,
        out_shape=(
            jax.ShapeDtypeStruct((rows_pad, vocab_pad), jnp.float32),
            jax.ShapeDtypeStruct((rows_pad, 1), jnp.float32),
        ),
        grid_spec=pltpu.PrefetchScalarGridSpec(
            num_scalar_prefetch=0,
            grid=(rows_pad // tile_rows, vocab_pad // tv, k_steps),
            in_specs=[
                pl.BlockSpec((tile_rows, tile_k), lambda i, j, k: (i, k)),
                pl.BlockSpec((tile_k, tv), lambda i, j, k: (k, j)),
                pl.BlockSpec((1, tv), lambda i, j, k: (0, j)),
            ],
            out_specs=[
                pl.BlockSpec((tile_rows, tv), lambda i, j, k: (i, j)),
                pl.BlockSpec((tile_rows, 1), lambda i, j, k: (i, 0)),
            ],
            scratch_shapes=[
                pltpu.VMEM((tile_rows, tv), jnp.float32),
                pltpu.VMEM((tile_rows, 1), jnp.float32),
                pltpu.VMEM((tile_rows, 1), jnp.float32),
            ],
        ),
        compiler_params=pltpu.CompilerParams(
            dimension_semantics=("parallel", "arbitrary", "arbitrary"),
            vmem_limit_bytes=vmem_limit,
        ),
    )(x2, wt_pad, b_pad)

    out = pl.pallas_call(
        _normalize_kernel,
        out_shape=jax.ShapeDtypeStruct((rows_pad, vocab_pad), out_dtype),
        grid_spec=pltpu.PrefetchScalarGridSpec(
            num_scalar_prefetch=0,
            grid=(rows_pad // tile_rows, vocab_pad // tv),
            in_specs=[
                pl.BlockSpec((tile_rows, tv), lambda i, j: (i, j)),
                pl.BlockSpec((tile_rows, 1), lambda i, j: (i, 0)),
            ],
            out_specs=pl.BlockSpec((tile_rows, tv), lambda i, j: (i, j)),
        ),
        compiler_params=pltpu.CompilerParams(
            dimension_semantics=("parallel", "parallel"),
            vmem_limit_bytes=vmem_limit,
        ),
    )(logits, lse)

    out = out[:rows, :vocab]
    return out.reshape(*orig_shape[:-1], vocab)


def make_generator(weight, bias, *, out_dtype=None, compute_dtype=None,
                   force_vocab_tiling=False, tile_v=None):
    """Hoists weight transpose/padding out of the hot path; returns forward(x)."""
    vocab, d_model = weight.shape
    d_pad, vocab_pad, tile_k = _plan_dims(d_model, vocab)
    wt_pad, b_pad = _pad_weights(weight, bias, d_pad, vocab_pad, compute_dtype)

    def forward(x):
        return _generator_apply(
            x, wt_pad, b_pad, vocab, tile_k=tile_k, out_dtype=out_dtype,
            compute_dtype=compute_dtype, force_vocab_tiling=force_vocab_tiling,
            tile_v=tile_v)

    return forward


def generator_forward(x, weight, bias, *, out_dtype=None, compute_dtype=None,
                      force_vocab_tiling=False, tile_v=None):
    """One-shot: log_softmax(x @ weight.T + bias, axis=-1)."""
    return make_generator(
        weight, bias, out_dtype=out_dtype, compute_dtype=compute_dtype,
        force_vocab_tiling=force_vocab_tiling, tile_v=tile_v)(x)


if __name__ == "__main__":
    key = jax.random.PRNGKey(0)
    batch, seq, d_model, vocab = 2, 8, 32, 11
    kx, kw, kb, kw2, kb2 = jax.random.split(key, 5)

    x = jax.random.normal(kx, (batch, seq, d_model), dtype=jnp.float32)
    bound = 1.0 / (d_model ** 0.5)
    weight = jax.random.uniform(
        kw, (vocab, d_model), minval=-bound, maxval=bound, dtype=jnp.float32)
    bias = jax.random.uniform(
        kb, (vocab,), minval=-bound, maxval=bound, dtype=jnp.float32)

    # --- test 1: fast fused path (weights prepared once via make_generator) --
    gen = make_generator(weight, bias)
    out = jax.block_until_ready(gen(x))
    ref = jax.nn.log_softmax(x @ weight.T + bias, axis=-1)
    assert out.shape == ref.shape
    assert jnp.allclose(out, ref, atol=3e-4, rtol=3e-4), float(
        jnp.max(jnp.abs(out - ref)))

    # --- test 2: vocab-tiled path with online log-sum-exp (forced) ----------
    vocab2 = 300
    weight2 = jax.random.uniform(
        kw2, (vocab2, d_model), minval=-bound, maxval=bound, dtype=jnp.float32)
    bias2 = jax.random.uniform(
        kb2, (vocab2,), minval=-bound, maxval=bound, dtype=jnp.float32)
    out2 = jax.block_until_ready(
        generator_forward(x, weight2, bias2,
                          force_vocab_tiling=True, tile_v=128))
    ref2 = jax.nn.log_softmax(x @ weight2.T + bias2, axis=-1)
    assert out2.shape == ref2.shape
    assert jnp.allclose(out2, ref2, atol=3e-4, rtol=3e-4), float(
        jnp.max(jnp.abs(out2 - ref2)))

    print("KERNEL_OK")
</pallas_src>

<mosaic_0001>
module attributes {stable_mosaic.version = 11 : i64} {
  func.func @_fused_kernel_k1(%arg0: i32, %arg1: memref<16x128xf32, #tpu.memory_space<vmem>>, %arg2: memref<128x128xf32, #tpu.memory_space<vmem>>, %arg3: memref<1x128xf32, #tpu.memory_space<vmem>>, %arg4: memref<16x128xf32, #tpu.memory_space<vmem>>) attributes {dimension_semantics = [#tpu.dimension_semantics<parallel>], iteration_bounds = array<i64: 1>, scalar_prefetch = 0 : i64, scratch_operands = 0 : i64, tpu.core_type = #tpu.core_type<tc>, window_params = [{transform_indices = @transform_0, window_bounds = array<i64: 16, 128>}, {pipeline_mode = #tpu.pipeline_mode<synchronous>, transform_indices = @transform_1, window_bounds = array<i64: 128, 128>}, {pipeline_mode = #tpu.pipeline_mode<synchronous>, transform_indices = @transform_2, window_bounds = array<i64: 1, 128>}, {transform_indices = @transform_3, window_bounds = array<i64: 16, 128>}]} {
    %c0 = arith.constant 0 : index
    %c0_0 = arith.constant 0 : index
    %0 = vector.load %arg1[%c0, %c0_0] : memref<16x128xf32, #tpu.memory_space<vmem>>, vector<16x128xf32>
    %c0_1 = arith.constant 0 : index
    %c0_2 = arith.constant 0 : index
    %1 = vector.load %arg2[%c0_1, %c0_2] : memref<128x128xf32, #tpu.memory_space<vmem>>, vector<128x128xf32>
    %cst = arith.constant dense<0.000000e+00> : vector<16x128xf32>
    %2 = tpu.matmul %0, %1, %cst {dimension_numbers = #tpu.dot_dimension_numbers<[1], [0], [0], [1], [0, 0, 1, 1], [], []>} : vector<16x128xf32>, vector<128x128xf32>, vector<16x128xf32> -> vector<16x128xf32>
    %c0_3 = arith.constant 0 : index
    %c0_4 = arith.constant 0 : index
    %3 = vector.load %arg3[%c0_3, %c0_4] : memref<1x128xf32, #tpu.memory_space<vmem>>, vector<1x128xf32>
    %4 = vector.broadcast %3 : vector<1x128xf32> to vector<16x128xf32>
    %5 = arith.addf %2, %4 : vector<16x128xf32>
    %cst_5 = arith.constant dense<0xFF800000> : vector<16xf32>
    %6 = vector.multi_reduction <maximumf>, %5, %cst_5 [1] : vector<16x128xf32> to vector<16xf32>
    %7 = vector.shape_cast %6 : vector<16xf32> to vector<16x1xf32>
    %8 = vector.broadcast %7 : vector<16x1xf32> to vector<16x128xf32>
    %9 = arith.subf %5, %8 : vector<16x128xf32>
    %10 = math.exp %9 : vector<16x128xf32>
    %cst_6 = arith.constant dense<0.000000e+00> : vector<16xf32>
    %11 = vector.multi_reduction <add>, %10, %cst_6 [1] : vector<16x128xf32> to vector<16xf32>
    %12 = vector.shape_cast %11 : vector<16xf32> to vector<16x1xf32>
    %13 = math.log %12 : vector<16x1xf32>
    %14 = vector.broadcast %13 : vector<16x1xf32> to vector<16x128xf32>
    %15 = arith.subf %9, %14 : vector<16x128xf32>
    %c0_7 = arith.constant 0 : index
    %c0_8 = arith.constant 0 : index
    %16 = vector.load %arg4[%c0_7, %c0_8] : memref<16x128xf32, #tpu.memory_space<vmem>>, vector<16x128xf32>
    tpu.vector_store %arg4[%c0_7, %c0_8], %15 {strides = array<i32>} : memref<16x128xf32, #tpu.memory_space<vmem>>, vector<16x128xf32>,
    return
  }
  func.func @transform_0(%arg0: i32) -> (i32, i32) {
    %c0_i32 = arith.constant 0 : i32
    %c0_i32_0 = arith.constant 0 : i32
    return %arg0, %c0_i32 : i32, i32
  }
  func.func @transform_1(%arg0: i32) -> (i32, i32) {
    %c0_i32 = arith.constant 0 : i32
    %c0_i32_0 = arith.constant 0 : i32
    %c0_i32_1 = arith.constant 0 : i32
    return %c0_i32, %c0_i32_0 : i32, i32
  }
  func.func @transform_2(%arg0: i32) -> (i32, i32) {
    %c0_i32 = arith.constant 0 : i32
    %c0_i32_0 = arith.constant 0 : i32
    %c0_i32_1 = arith.constant 0 : i32
    return %c0_i32, %c0_i32_0 : i32, i32
  }
  func.func @transform_3(%arg0: i32) -> (i32, i32) {
    %c0_i32 = arith.constant 0 : i32
    %c0_i32_0 = arith.constant 0 : i32
    return %arg0, %c0_i32 : i32, i32
  }
}

</mosaic_0001>

<bundles_post_ra>
// kernel: tpu_custom_call.1
= control target key start
LH: loop header
LB: loop body
LE: loop exit
PB: predicated region body
PF: predicated region fallthrough
CT: control target
= control target key end

     0   :  { %8 = vsyncpa [#allocation3], 0  ;;  %s427_s0 = inlined_call_operand.hbm [shape: f32[16,128], index: 0, kind: input, shape index: {}]   ;;  %s428_s1 = inlined_call_operand.hbm [shape: f32[128,128], index: 1, kind: input, shape index: {}]   ;;  %s429_s2 = inlined_call_operand.vmem [shape: f32[1,128], index: 2, kind: input, shape index: {}]   ;;  %s430_s3 = inlined_call_operand.hbm [shape: f32[16,128], index: 3, kind: output, shape index: {}]  }
   0x1   :  { %9 = vsyncpa [#allocation6], 0 }
   0x2   :  { %10 = vsyncpa [#allocation4], 0  ;;  %s354_s12 = smov [#allocation2]   ;;  %s282_s16 = scalar_lea.hbm %s427_s0, 256 }
   0x3   :  { %s16_s13 = sshll.u32 %s354_s12, 4  ;;  %p283_p0 = scmp.ne.s32.totalorder %s427_s0, %s282_s16  ;;  %s17_s13 = int_to_ptr.vmem [resolvable:$true] %s16_s13 }
   0x4   :  { %p286_p1 = scmp.lt.u32.totalorder %s282_s16, %s427_s0 }
   0x6   :  { %p288_p2 = pnand %p286_p1, %p283_p0 }
   0x8   :  { %291 = shalt.err (!%p288_p2)
}
   0x9   :  { %s292_s21 = scalar_lea.vmem %s17_s13, 256  ;;  %p297_p4 = scmp.lt.s32.totalorder %s17_s13, %s17_s13 }
   0xa   :  { %p293_p3 = scmp.ne.s32.totalorder %s17_s13, %s292_s21  ;;  %p298_p5 = scmp.lt.s32.totalorder %s292_s21, %s292_s21 }
   0xc   :  { %p299_p6 = por %p298_p5, %p297_p4 }
   0xe   :  { %p300_p7 = pnand %p299_p6, %p293_p3 }
  0x10   :  { %303 = shalt.err (!%p300_p7)
}
  0x11   :  { %s355_s22 = smov 128   ;;  %s356_s23 = smov 8  }
  0x12   :  { %22 = dma.hbm_to_vmem [thread:$0]  %s427_s0, 256, %s17_s13, [#allocation3], %s355_s22, %s355_s22, %s356_s23  }
  0x13   :  { %s357_s26 = smov [#allocation5]   ;;  %s304_s30 = scalar_lea.hbm %s428_s1, 2048 }
  0x14   :  { %s28_s27 = sshll.u32 %s357_s26, 4  ;;  %p305_p8 = scmp.ne.s32.totalorder %s428_s1, %s304_s30  ;;  %s29_s27 = int_to_ptr.vmem [resolvable:$true] %s28_s27 }
  0x15   :  { %p308_p9 = scmp.lt.u32.totalorder %s304_s30, %s428_s1 }
  0x17   :  { %p310_p10 = pnand %p308_p9, %p305_p8 }
  0x19   :  { %313 = shalt.err (!%p310_p10)
}
  0x1a   :  { %s314_s8 = scalar_lea.vmem %s29_s27, 2048  ;;  %p319_p12 = scmp.lt.s32.totalorder %s29_s27, %s29_s27 }
  0x1b   :  { %p315_p11 = scmp.ne.s32.totalorder %s29_s27, %s314_s8  ;;  %p320_p13 = scmp.lt.s32.totalorder %s314_s8, %s314_s8 }
  0x1d   :  { %p321_p0 = por %p320_p13, %p319_p12 }
  0x1f   :  { %p322_p1 = pnand %p321_p0, %p315_p11 }
  0x21   :  { %325 = shalt.err (!%p322_p1)
}
  0x22   :  { %34 = dma.hbm_to_vmem [thread:$0]  %s428_s1, 2048, %s29_s27, [#allocation6], %s355_s22, %s355_s22, %s356_s23  }
  0x23   :  { %348 = dma.done.wait [#allocation3], 256  }
  0x24   :  { %349 = vsyncadd [#allocation3], 4294967040 }
  0x25   :  { %350 = dma.done.wait [#allocation6], 2048  }
  0x26   :  { %351 = vsyncadd [#allocation6], 4294965248  ;;  %v45_v0 = vld [vmem:[#allocation5] sm:$0xff]  ;;  %v46_v1 = vld [vmem:[#allocation5 + $0x8] sm:$0xff] }
  0x27   :  { %v47_v2 = vld [vmem:[#allocation5 + $0x10] sm:$0xff]  ;;  %v237_v3 = vpack.c.bf16 %v46_v1, %v45_v0  ;;  %v48_v4 = vld [vmem:[#allocation5 + $0x18] sm:$0xff]  ;;  %v49_v6 = vld [vmem:[#allocation5 + $0x20] sm:$0xff] }
  0x28   :  { %v241_v5 = vpack.c.bf16 %v48_v4, %v47_v2  ;;  %v50_v7 = vld [vmem:[#allocation5 + $0x28] sm:$0xff]  ;;  %v43_v9 = vld [vmem:[#allocation2] sm:$0xff]  ;;  %v52_v11 = vld [vmem:[#allocation5 + $0x38] sm:$0xff] }
  0x29   :  { %238 = vmatprep.subr.bf16.mxu0 %v237_v3  ;;  %v245_v8 = vpack.c.bf16 %v50_v7, %v49_v6  ;;  %v51_v10 = vld [vmem:[#allocation5 + $0x30] sm:$0xff]  ;;  %234 = vmatprep.mubr.f32.mxu0 %v43_v9  ;;  %v53_v13 = vld [vmem:[#allocation5 + $0x40] sm:$0xff]  ;;  %v54_v14 = vld [vmem:[#allocation5 + $0x48] sm:$0xff] }
  0x2a   :  { %240 = vmatpush3.bf16.msra.mxu0 %v237_v3  ;;  %v249_v12 = vpack.c.bf16 %v52_v11, %v51_v10  ;;  %v253_v15 = vpack.c.bf16 %v54_v14, %v53_v13  ;;  %v55_v16 = vld [vmem:[#allocation5 + $0x50] sm:$0xff]  ;;  %v56_v17 = vld [vmem:[#allocation5 + $0x58] sm:$0xff]  ;;  %v57_v19 = vld [vmem:[#allocation5 + $0x60] sm:$0xff] }
  0x2b   :  { %242 = vmatprep.subr.bf16.mxu0 %v241_v5  ;;  %v257_v18 = vpack.c.bf16 %v56_v17, %v55_v16  ;;  %v58_v20 = vld [vmem:[#allocation5 + $0x68] sm:$0xff]  ;;  %v59_v22 = vld [vmem:[#allocation5 + $0x70] sm:$0xff]  ;;  %v60_v23 = vld [vmem:[#allocation5 + $0x78] sm:$0xff] }
  0x2c   :  { %v261_v21 = vpack.c.bf16 %v58_v20, %v57_v19  ;;  %v265_v24 = vpack.c.bf16 %v60_v23, %v59_v22  ;;  %v44_v25 = vld [vmem:[#allocation2 + $0x8] sm:$0xff]  ;;  %v183_v26 = vld [vmem:[%s429_s2] ss:$0 sm:$0xff]  ;;  %s358_s2 = smov [#allocation7]  }
  0x2d   :  { %s170_s11 = sshll.u32 %s358_s2, 4  ;;  %s171_s11 = int_to_ptr.vmem [resolvable:$true] %s170_s11 }
  0x2e   :  { %244 = vmatpush3.bf16.msra.mxu0 %v241_v5  ;;  %s326_s12 = scalar_lea.vmem %s171_s11, 256  ;;  %p331_p3 = scmp.lt.s32.totalorder %s171_s11, %s171_s11 }
  0x2f   :  { %246 = vmatprep.subr.bf16.mxu0 %v245_v8  ;;  %p327_p2 = scmp.ne.s32.totalorder %s171_s11, %s326_s12  ;;  %p332_p4 = scmp.lt.s32.totalorder %s326_s12, %s326_s12 }
  0x31   :  { %p333_p5 = por %p332_p4, %p331_p3 }
  0x32   :  { %248 = vmatpush3.bf16.msra.mxu0 %v245_v8 }
  0x33   :  { %250 = vmatprep.subr.bf16.mxu0 %v249_v12  ;;  %p334_p6 = pnand %p333_p5, %p327_p2 }
  0x36   :  { %252 = vmatpush3.bf16.msra.mxu0 %v249_v12 }
  0x37   :  { %254 = vmatprep.subr.bf16.mxu0 %v253_v15 }
  0x3a   :  { %256 = vmatpush3.bf16.msra.mxu0 %v253_v15 }
  0x3b   :  { %258 = vmatprep.subr.bf16.mxu0 %v257_v18 }
  0x3e   :  { %260 = vmatpush3.bf16.msra.mxu0 %v257_v18 }
  0x3f   :  { %262 = vmatprep.subr.bf16.mxu0 %v261_v21 }
  0x42   :  { %264 = vmatpush3.bf16.msra.mxu0 %v261_v21 }
  0x43   :  { %266 = vmatprep.subr.bf16.mxu0 %v265_v24 }
  0x46   :  { %268 = vmatpush3.bf16.msra.mxu0 %v265_v24 }
  0x49   :  { %235 = vmatmul.mubr.f32.vlgmr.msra.gmra.mrb[0].mxu0 %v44_v25 }
 0x11c   :  { %v236_v27 = vpop.f32.mrb[0].mxu0 }
 0x11d   :  { %v134_v28 = vpop.f32.mrb[1].mxu0  ;;  %v140_v30 = vadd.f32 %v236_v27, %v183_v26 }
 0x11e   :  { %v135_v29 = vadd.f32 %v183_v26, %v134_v28 }
 0x120   :  { %143 = vmax.xlane.f32.xlu0 %v135_v29 }
 0x124   :  { %145 = vmax.xlane.f32.xlu0 %v140_v30 }
 0x1ad   :  { %v144_v31 = vpop.xlane.xlu0 %143 }
 0x1ae   :  { %v147_v32 = vsub.f32 %v135_v29, %v144_v31 }
 0x1b0   :  { %v149_v33 = vmul.f32 1.442695, %v147_v32 }
 0x1b1   :  { %v146_v34 = vpop.xlane.xlu0 %145 }
 0x1b2   :  { %v148_v35 = vsub.f32 %v140_v30, %v146_v34  ;;  %274 = vpow2.f32 %v149_v33 }
 0x1b4   :  { %v151_v36 = vmul.f32 1.442695, %v148_v35 }
 0x1b6   :  { %276 = vpow2.f32 %v151_v36 }
 0x1bc   :  { %v275_v37 = vpop.eup %274 }
 0x1bd   :  { %153 = vadd.xlane.f32.xlu1 %v275_v37 }
 0x1c0   :  { %v277_v38 = vpop.eup %276 }
 0x1c1   :  { %155 = vadd.xlane.f32.xlu1 %v277_v38 }
 0x24a   :  { %v154_v39 = vpop.xlane.xlu1 %153 }
 0x24b   :  { %278 = vlog2.f32 %v154_v39 }
 0x24e   :  { %v156_v40 = vpop.xlane.xlu1 %155 }
 0x24f   :  { %280 = vlog2.f32 %v156_v40 }
 0x255   :  { %v279_v41 = vpop.eup %278 }
 0x256   :  { %v158_v42 = vmul.f32 0.6931472, %v279_v41 }
 0x258   :  { %v161_v43 = vsub.f32 %v147_v32, %v158_v42 }
 0x259   :  { %v281_v44 = vpop.eup %280 }
 0x25a   :  { %163 = vst [vmem:[#allocation7] sm:$0xff] %v161_v43  ;;  %v160_v45 = vmul.f32 0.6931472, %v281_v44 }
 0x25c   :  { %v162_v46 = vsub.f32 %v148_v35, %v160_v45 }
 0x25e   :  { %164 = vst [vmem:[#allocation7 + $0x8] sm:$0xff] %v162_v46 }
 0x25f   :  { %337 = shalt.err (!%p334_p6)
}
 0x260   :  { %s338_s15 = scalar_lea.hbm %s430_s3, 256 }
 0x261   :  { %p339_p7 = scmp.ne.s32.totalorder %s430_s3, %s338_s15  ;;  %p342_p8 = scmp.lt.u32.totalorder %s338_s15, %s430_s3 }
 0x263   :  { %p344_p9 = pnand %p342_p8, %p339_p7 }
 0x265   :  { %347 = shalt.err (!%p344_p9)
}
 0x266   :  { %176 = dma.vmem_to_hbm [thread:$0]  %s171_s11, 256, %s430_s3, [#allocation4], %s355_s22, %s355_s22, %s356_s23  }
 0x267   :  { %352 = dma.done.wait [#allocation4], 256  }
 0x268   :  { %353 = vsyncadd [#allocation4], 4294967040 }
 0x269   :  { %180 = vsyncpa [#allocation3], 1 }
 0x26a   :  { %181 = vsyncpa [#allocation6], 1 }
 0x26b   :  { %182 = vsyncpa [#allocation4], 1 }

</bundles_post_ra>
